<compile_context>
chip_gen: v5e
topology: v5e:2x2
jax: 0.10.0
libtpu: 0.0.40
codegen_flags: <defaults>
</compile_context>

<pallas_src>
import functools
import math

import jax
import jax.numpy as jnp
from jax.experimental import pallas as pl
from jax.experimental.pallas import tpu as pltpu

_LANES = 128
_SUBLANES = 8
_PACK_MAX_LANES = 384      # max packed row width (lcm(C, 128)) for the MXU path
_ROW_CAP = 4096            # row-tile cap; VMEM budget is the real limiter
_LANE_CAP = 8192           # lane-tile cap for the channels_first path
_F32_TEMPS = 6             # live f32 temporaries per element inside the kernels


# ----------------------- hardware-aware sizing helpers -----------------------

@functools.lru_cache(maxsize=1)
def _vmem_params():
    """(vmem_limit_bytes, working-set budget) sized per TPU generation."""
    phys = 64 << 20            # conservative default (v7x has 64 MiB per TC)
    try:
        get_info = getattr(pltpu, "get_tpu_info", None)
        if get_info is not None:
            v = getattr(get_info(), "vmem_capacity_bytes", None)
            if v:
                phys = int(v)
    except Exception:
        pass
    limit = max(16 << 20, min((phys * 3) // 4, 96 << 20))
    budget = max(4 << 20, min(phys // 4, 24 << 20))
    return limit, budget


@functools.lru_cache(maxsize=1)
def _num_tensorcores():
    """Best-effort TensorCore count (v7x megacore = 2); default 1 (v5e/v6e)."""
    try:
        dev = jax.devices()[0]
        for attr in ("num_cores", "core_count", "num_tensorcores"):
            v = getattr(dev, attr, None)
            if isinstance(v, int) and v > 0:
                return v
    except Exception:
        pass
    return 1


def _choose_row_tile(n_rows, row_elems, io_itemsize, *, budget, num_cores,
                     cap=_ROW_CAP):
    """Largest row tile whose total footprint (2x double-buffered in + out at
    the I/O dtype, plus ~6 single-buffered f32 temporaries) fits the budget.
    Only splits a single-block problem when the part has >1 TensorCore."""
    bytes_per_row = 4 * row_elems * io_itemsize + _F32_TEMPS * row_elems * 4
    tm = min(cap, max(_SUBLANES, budget // max(1, bytes_per_row)))
    tm = max(_SUBLANES, (tm // _SUBLANES) * _SUBLANES)
    if tm >= n_rows:
        tm = n_rows
        if num_cores > 1 and n_rows >= 2 * _SUBLANES:
            half = -(-n_rows // 2)
            tm = -(-half // _SUBLANES) * _SUBLANES
            if tm >= n_rows:
                tm = n_rows
    return tm


def _choose_w_tile(hw, c, n_batch, io_itemsize, *, budget, num_cores,
                   cap=_LANE_CAP):
    """Lane tile for the channels_first path: multiple of 128 (or full HW)."""
    bytes_per_col = 4 * c * io_itemsize + _F32_TEMPS * c * 4
    tw = min(cap, max(_LANES, budget // max(1, bytes_per_col)))
    tw = max(_LANES, (tw // _LANES) * _LANES)
    if tw >= hw:
        tw = hw
        if num_cores > 1 and n_batch < 2 and hw >= 2 * _LANES:
            half = -(-hw // 2)
            tw = -(-half // _LANES) * _LANES
            if tw >= hw:
                tw = hw
    return tw


# ----------------------------- kernels --------------------------------------

def _ln_rows_kernel(x_ref, w_ref, b_ref, o_ref, *, eps):
    """LayerNorm over the last axis of a (tm, C) block (generic fallback)."""
    x = x_ref[...].astype(jnp.float32)
    mean = jnp.mean(x, axis=-1, keepdims=True)
    xc = x - mean
    var = jnp.mean(xc * xc, axis=-1, keepdims=True)
    inv = jax.lax.rsqrt(var + eps)
    w = w_ref[...].astype(jnp.float32)          # (1, C)
    b = b_ref[...].astype(jnp.float32)
    o_ref[...] = (xc * inv * w + b).astype(o_ref.dtype)


def _ln_packed_kernel(x_ref, bd_ref, w_ref, b_ref, o_ref, *, c, eps):
    """Lane-dense LayerNorm: each P-lane row packs k = P // c logical rows.

    Segment sums (and their broadcast back across the segment) are done as a
    single MXU matmul against a constant (P, P) block-diagonal ones matrix;
    the MXU is otherwise idle in this memory-bound kernel and the XLU/VPU
    masked-reduction passes of the old version are gone.
    # TODO(synk): for P > 128 a compact (P, k) reduce + (k, P) broadcast pair
    # would cut MXU flops by ~2*P/k at the cost of narrow-operand matmuls.
    """
    x = x_ref[...].astype(jnp.float32)                       # (tm, P)
    bd = bd_ref[...]                                         # (P, P) f32
    inv_c = jnp.float32(1.0 / c)
    mean = jnp.dot(x, bd, precision=jax.lax.Precision.HIGHEST,
                   preferred_element_type=jnp.float32) * inv_c
    xc = x - mean
    var = jnp.dot(xc * xc, bd, precision=jax.lax.Precision.HIGHEST,
                  preferred_element_type=jnp.float32) * inv_c
    inv = jax.lax.rsqrt(var + eps)
    w = w_ref[...].astype(jnp.float32)                       # (1, P), tiled
    b = b_ref[...].astype(jnp.float32)
    o_ref[...] = (xc * inv * w + b).astype(o_ref.dtype)


def _ln_cfirst_kernel(x_ref, w_ref, b_ref, o_ref, *, eps):
    """channels_first LayerNorm: reduce over the C (sublane) axis of (1,C,TW).

    The sublane-direction reduction is mostly plain VPU adds across vregs
    (cheap); lane utilization is full since TW is a multiple of 128.
    # TODO(synk): for very large C on v7x, offload this reduction to the MXU
    # with a (C, C) ones matrix if the XLU tail ever shows up in profiles.
    """
    x = x_ref[...].astype(jnp.float32)                       # (1, C, TW)
    mean = jnp.mean(x, axis=1, keepdims=True)                # (1, 1, TW)
    xc = x - mean
    var = jnp.mean(xc * xc, axis=1, keepdims=True)
    inv = jax.lax.rsqrt(var + eps)
    w = w_ref[...].astype(jnp.float32)                       # (C, 1)
    b = b_ref[...].astype(jnp.float32)
    o_ref[...] = (xc * inv * w + b).astype(o_ref.dtype)


# ----------------------------- wrappers --------------------------------------

def _ln_channels_last_2d(x2d, weight, bias, eps):
    M, C = x2d.shape
    itemsize = jnp.dtype(x2d.dtype).itemsize
    weight = weight.reshape(-1)
    bias = bias.reshape(-1)
    vmem_limit, budget = _vmem_params()
    cores = _num_tensorcores()

    # Lane-dense packing: k logical rows per packed row, P = k*C = lcm(C, 128).
    k = _LANES // math.gcd(C, _LANES)
    P = k * C
    packable = (k >= 2) and (M % k == 0) and (P <= _PACK_MAX_LANES)

    if packable:
        mp = M // k
        xp = x2d.reshape(mp, P)                       # free reshape (contiguous)
        wp = jnp.tile(weight, k).reshape(1, P)
        bp = jnp.tile(bias, k).reshape(1, P)
        lane = jnp.arange(P, dtype=jnp.int32)
        bd = (lane[:, None] // C == lane[None, :] // C).astype(jnp.float32)
        tm = _choose_row_tile(mp, P, itemsize, budget=budget, num_cores=cores)
        cost = pl.CostEstimate(
            flops=8 * M * C + 4 * mp * P * P,
            transcendentals=mp * P,
            bytes_accessed=2 * M * C * itemsize + P * P * 4 + 2 * P * 4)
        out = pl.pallas_call(
            functools.partial(_ln_packed_kernel, c=C, eps=eps),
            out_shape=jax.ShapeDtypeStruct((mp, P), x2d.dtype),
            grid=(pl.cdiv(mp, tm),),
            in_specs=[
                pl.BlockSpec((tm, P), lambda i: (i, 0)),
                pl.BlockSpec((P, P), lambda i: (0, 0)),   # resident constant
                pl.BlockSpec((1, P), lambda i: (0, 0)),
                pl.BlockSpec((1, P), lambda i: (0, 0)),
            ],
            out_specs=pl.BlockSpec((tm, P), lambda i: (i, 0)),
            compiler_params=pltpu.CompilerParams(
                dimension_semantics=("parallel",),
                vmem_limit_bytes=vmem_limit),
            cost_estimate=cost,
        )(xp, bd, wp, bp)
        return out.reshape(M, C)

    # Fallback: (tm, C) row blocks, partial last block clipped by Pallas.
    w2d = weight.reshape(1, C)
    b2d = bias.reshape(1, C)
    tm = _choose_row_tile(M, C, itemsize, budget=budget, num_cores=cores)
    cost = pl.CostEstimate(
        flops=8 * M * C,
        transcendentals=M,
        bytes_accessed=2 * M * C * itemsize + 2 * C * 4)
    out = pl.pallas_call(
        functools.partial(_ln_rows_kernel, eps=eps),
        out_shape=jax.ShapeDtypeStruct((M, C), x2d.dtype),
        grid=(pl.cdiv(M, tm),),
        in_specs=[
            pl.BlockSpec((tm, C), lambda i: (i, 0)),
            pl.BlockSpec((1, C), lambda i: (0, 0)),
            pl.BlockSpec((1, C), lambda i: (0, 0)),
        ],
        out_specs=pl.BlockSpec((tm, C), lambda i: (i, 0)),
        compiler_params=pltpu.CompilerParams(
            dimension_semantics=("parallel",),
            vmem_limit_bytes=vmem_limit),
        cost_estimate=cost,
    )(x2d, w2d, b2d)
    return out


def _ln_channels_first(x, weight, bias, eps):
    N, C, H, W = x.shape
    HW = H * W
    itemsize = jnp.dtype(x.dtype).itemsize
    vmem_limit, budget = _vmem_params()
    cores = _num_tensorcores()
    x3 = x.reshape(N, C, HW)                         # free reshape (contiguous)
    wc = weight.reshape(C, 1)
    bc = bias.reshape(C, 1)
    tw = _choose_w_tile(HW, C, N, itemsize, budget=budget, num_cores=cores)
    out = pl.pallas_call(
        functools.partial(_ln_cfirst_kernel, eps=eps),
        out_shape=jax.ShapeDtypeStruct((N, C, HW), x.dtype),
        grid=(N, pl.cdiv(HW, tw)),
        in_specs=[
            pl.BlockSpec((1, C, tw), lambda n, j: (n, 0, j)),
            pl.BlockSpec((C, 1), lambda n, j: (0, 0)),
            pl.BlockSpec((C, 1), lambda n, j: (0, 0)),
        ],
        out_specs=pl.BlockSpec((1, C, tw), lambda n, j: (n, 0, j)),
        compiler_params=pltpu.CompilerParams(
            dimension_semantics=("parallel", "parallel"),
            vmem_limit_bytes=vmem_limit),
        cost_estimate=pl.CostEstimate(
            flops=8 * N * C * HW,
            transcendentals=N * HW,
            bytes_accessed=2 * N * C * HW * itemsize + 2 * C * 4),
    )(x3, wc, bc)
    return out.reshape(N, C, H, W)


def layer_norm(x, weight, bias, eps=1e-6, data_format="channels_last"):
    """Matches the PyTorch LayerNorm module forward.

    channels_last : x is (..., C), normalize over the last dim.
    channels_first: x is (N, C, H, W), normalize over dim 1 (no transposes).
    """
    if data_format not in ("channels_last", "channels_first"):
        raise NotImplementedError
    if data_format == "channels_last":
        C = x.shape[-1]
        lead = x.shape[:-1]
        out = _ln_channels_last_2d(x.reshape(-1, C), weight, bias, eps)
        return out.reshape(*lead, C)
    return _ln_channels_first(x, weight, bias, eps)


# ----------------------------- reference -------------------------------------

def _ref_layer_norm(x, weight, bias, eps, data_format):
    if data_format == "channels_last":
        u = jnp.mean(x, axis=-1, keepdims=True)
        s = jnp.mean((x - u) ** 2, axis=-1, keepdims=True)
        xn = (x - u) / jnp.sqrt(s + eps)
        return xn * weight + bias
    u = jnp.mean(x, axis=1, keepdims=True)
    s = jnp.mean((x - u) ** 2, axis=1, keepdims=True)
    xn = (x - u) / jnp.sqrt(s + eps)
    return weight[None, :, None, None] * xn + bias[None, :, None, None]


if __name__ == "__main__":
    key = jax.random.PRNGKey(0)
    k1, k2, k3, k4 = jax.random.split(key, 4)
    eps = 1e-6

    # ---- channels_last, C=32 (packed MXU path, P=128) ----
    C = 32
    weight = jnp.ones((C,), jnp.float32) + 0.01 * jnp.arange(C, dtype=jnp.float32)
    bias = 0.001 * jnp.arange(C, dtype=jnp.float32)
    x_last = jax.random.normal(k1, (2, 8, 8, C), dtype=jnp.float32)
    y_last = jax.block_until_ready(
        layer_norm(x_last, weight, bias, eps, "channels_last"))
    ref_last = _ref_layer_norm(x_last, weight, bias, eps, "channels_last")
    assert jnp.allclose(y_last, ref_last, atol=1e-4, rtol=1e-4)

    # ---- channels_last, C=96 (generalized packed MXU path, P=384) ----
    C96 = 96
    weight96 = jnp.ones((C96,), jnp.float32) - 0.003 * jnp.arange(C96, dtype=jnp.float32)
    bias96 = 0.002 * jnp.arange(C96, dtype=jnp.float32)
    x_last96 = jax.random.normal(k2, (2, 4, 4, C96), dtype=jnp.float32)
    y_last96 = jax.block_until_ready(
        layer_norm(x_last96, weight96, bias96, eps, "channels_last"))
    ref_last96 = _ref_layer_norm(x_last96, weight96, bias96, eps, "channels_last")
    assert jnp.allclose(y_last96, ref_last96, atol=1e-4, rtol=1e-4)

    # ---- channels_last, C=48 with M % k != 0 (row-kernel fallback path) ----
    C48 = 48
    weight48 = jnp.ones((C48,), jnp.float32) - 0.005 * jnp.arange(C48, dtype=jnp.float32)
    bias48 = 0.002 * jnp.arange(C48, dtype=jnp.float32)
    x_last48 = jax.random.normal(k3, (2, 7, 7, C48), dtype=jnp.float32)
    y_last48 = jax.block_until_ready(
        layer_norm(x_last48, weight48, bias48, eps, "channels_last"))
    ref_last48 = _ref_layer_norm(x_last48, weight48, bias48, eps, "channels_last")
    assert jnp.allclose(y_last48, ref_last48, atol=1e-4, rtol=1e-4)

    # ---- channels_first, (N, C, H, W) (native sublane-reduction path) ----
    x_first = jax.random.normal(k4, (2, C, 8, 8), dtype=jnp.float32)
    y_first = jax.block_until_ready(
        layer_norm(x_first, weight, bias, eps, "channels_first"))
    ref_first = _ref_layer_norm(x_first, weight, bias, eps, "channels_first")
    assert jnp.allclose(y_first, ref_first, atol=1e-4, rtol=1e-4)

    print("KERNEL_OK")
</pallas_src>

<mosaic_0001>
module attributes {stable_mosaic.version = 11 : i64} {
  func.func @_ln_packed_kernel(%arg0: i32, %arg1: memref<32x128xf32, #tpu.memory_space<vmem>>, %arg2: memref<128x128xf32, #tpu.memory_space<vmem>>, %arg3: memref<1x128xf32, #tpu.memory_space<vmem>>, %arg4: memref<1x128xf32, #tpu.memory_space<vmem>>, %arg5: memref<32x128xf32, #tpu.memory_space<vmem>>) attributes {dimension_semantics = [#tpu.dimension_semantics<parallel>], iteration_bounds = array<i64: 1>, scalar_prefetch = 0 : i64, scratch_operands = 0 : i64, tpu.core_type = #tpu.core_type<tc>, window_params = [{transform_indices = @transform_0, window_bounds = array<i64: 32, 128>}, {pipeline_mode = #tpu.pipeline_mode<synchronous>, transform_indices = @transform_1, window_bounds = array<i64: 128, 128>}, {pipeline_mode = #tpu.pipeline_mode<synchronous>, transform_indices = @transform_2, window_bounds = array<i64: 1, 128>}, {pipeline_mode = #tpu.pipeline_mode<synchronous>, transform_indices = @transform_3, window_bounds = array<i64: 1, 128>}, {transform_indices = @transform_4, window_bounds = array<i64: 32, 128>}]} {
    %c0 = arith.constant 0 : index
    %c0_0 = arith.constant 0 : index
    %0 = vector.load %arg1[%c0, %c0_0] : memref<32x128xf32, #tpu.memory_space<vmem>>, vector<32x128xf32>
    %c0_1 = arith.constant 0 : index
    %c0_2 = arith.constant 0 : index
    %1 = vector.load %arg2[%c0_1, %c0_2] : memref<128x128xf32, #tpu.memory_space<vmem>>, vector<128x128xf32>
    %cst = arith.constant dense<0.000000e+00> : vector<32x128xf32>
    %2 = tpu.matmul %0, %1, %cst {dimension_numbers = #tpu.dot_dimension_numbers<[1], [0], [0], [1], [0, 0, 1, 1], [], []>, precision = #tpu.contract_precision<fp32>} : vector<32x128xf32>, vector<128x128xf32>, vector<32x128xf32> -> vector<32x128xf32>
    %cst_3 = arith.constant 3.125000e-02 : f32
    %3 = vector.broadcast %cst_3 : f32 to vector<32x128xf32>
    %4 = arith.mulf %2, %3 : vector<32x128xf32>
    %5 = arith.subf %0, %4 : vector<32x128xf32>
    %6 = arith.mulf %5, %5 : vector<32x128xf32>
    %cst_4 = arith.constant dense<0.000000e+00> : vector<32x128xf32>
    %7 = tpu.matmul %6, %1, %cst_4 {dimension_numbers = #tpu.dot_dimension_numbers<[1], [0], [0], [1], [0, 0, 1, 1], [], []>, precision = #tpu.contract_precision<fp32>} : vector<32x128xf32>, vector<128x128xf32>, vector<32x128xf32> -> vector<32x128xf32>
    %cst_5 = arith.constant 3.125000e-02 : f32
    %8 = vector.broadcast %cst_5 : f32 to vector<32x128xf32>
    %9 = arith.mulf %7, %8 : vector<32x128xf32>
    %cst_6 = arith.constant 9.99999997E-7 : f32
    %10 = vector.broadcast %cst_6 : f32 to vector<32x128xf32>
    %11 = arith.addf %9, %10 : vector<32x128xf32>
    %12 = math.rsqrt %11 : vector<32x128xf32>
    %c0_7 = arith.constant 0 : index
    %c0_8 = arith.constant 0 : index
    %13 = vector.load %arg3[%c0_7, %c0_8] : memref<1x128xf32, #tpu.memory_space<vmem>>, vector<1x128xf32>
    %c0_9 = arith.constant 0 : index
    %c0_10 = arith.constant 0 : index
    %14 = vector.load %arg4[%c0_9, %c0_10] : memref<1x128xf32, #tpu.memory_space<vmem>>, vector<1x128xf32>
    %15 = arith.mulf %5, %12 : vector<32x128xf32>
    %16 = vector.broadcast %13 : vector<1x128xf32> to vector<32x128xf32>
    %17 = arith.mulf %15, %16 : vector<32x128xf32>
    %18 = vector.broadcast %14 : vector<1x128xf32> to vector<32x128xf32>
    %19 = arith.addf %17, %18 : vector<32x128xf32>
    %c0_11 = arith.constant 0 : index
    %c0_12 = arith.constant 0 : index
    %20 = vector.load %arg5[%c0_11, %c0_12] : memref<32x128xf32, #tpu.memory_space<vmem>>, vector<32x128xf32>
    tpu.vector_store %arg5[%c0_11, %c0_12], %19 {strides = array<i32>} : memref<32x128xf32, #tpu.memory_space<vmem>>, vector<32x128xf32>,
    return
  }
  func.func @transform_0(%arg0: i32) -> (i32, i32) {
    %c0_i32 = arith.constant 0 : i32
    %c0_i32_0 = arith.constant 0 : i32
    return %arg0, %c0_i32 : i32, i32
  }
  func.func @transform_1(%arg0: i32) -> (i32, i32) {
    %c0_i32 = arith.constant 0 : i32
    %c0_i32_0 = arith.constant 0 : i32
    %c0_i32_1 = arith.constant 0 : i32
    return %c0_i32, %c0_i32_0 : i32, i32
  }
  func.func @transform_2(%arg0: i32) -> (i32, i32) {
    %c0_i32 = arith.constant 0 : i32
    %c0_i32_0 = arith.constant 0 : i32
    %c0_i32_1 = arith.constant 0 : i32
    return %c0_i32, %c0_i32_0 : i32, i32
  }
  func.func @transform_3(%arg0: i32) -> (i32, i32) {
    %c0_i32 = arith.constant 0 : i32
    %c0_i32_0 = arith.constant 0 : i32
    %c0_i32_1 = arith.constant 0 : i32
    return %c0_i32, %c0_i32_0 : i32, i32
  }
  func.func @transform_4(%arg0: i32) -> (i32, i32) {
    %c0_i32 = arith.constant 0 : i32
    %c0_i32_0 = arith.constant 0 : i32
    return %arg0, %c0_i32 : i32, i32
  }
}

</mosaic_0001>

<bundles_post_ra>
// kernel: tpu_custom_call.1
= control target key start
LH: loop header
LB: loop body
LE: loop exit
PB: predicated region body
PF: predicated region fallthrough
CT: control target
= control target key end

     0   :  { %9 = vsyncpa [#allocation3], 0  ;;  %s1647_s0 = inlined_call_operand.hbm [shape: f32[32,128], index: 0, kind: input, shape index: {}]   ;;  %s1648_s1 = inlined_call_operand.hbm [shape: f32[128,128], index: 1, kind: input, shape index: {}]   ;;  %s1649_s2 = inlined_call_operand.vmem [shape: f32[1,128], index: 2, kind: input, shape index: {}]   ;;  %s1650_s3 = inlined_call_operand.vmem [shape: f32[1,128], index: 3, kind: input, shape index: {}]   ;;  %s1651_s4 = inlined_call_operand.hbm [shape: f32[32,128], index: 4, kind: output, shape index: {}]  }
   0x1   :  { %10 = vsyncpa [#allocation6], 0 }
   0x2   :  { %11 = vsyncpa [#allocation4], 0  ;;  %s16_s17 = sshll.u32 %s1647_s0, 4  ;;  %s1135_s18 = smov [#allocation2]   ;;  %s17_s17 = int_to_ptr.hbm [resolvable:$true] %s16_s17 }
   0x3   :  { %s18_s19 = sshll.u32 %s1135_s18, 4  ;;  %s29_s22 = sshll.u32 %s1648_s1, 4  ;;  %s19_s19 = int_to_ptr.vmem [resolvable:$true] %s18_s19  ;;  %s30_s22 = int_to_ptr.hbm [resolvable:$true] %s29_s22 }
   0x4   :  { %s1136_s23 = smov 128   ;;  %s1137_s24 = smov 8  }
   0x5   :  { %24 = dma.hbm_to_vmem [thread:$0]  %s17_s17, 512, %s19_s19, [#allocation3], %s1136_s23, %s1136_s23, %s1137_s24  }
   0x6   :  { %s1138_s25 = smov [#allocation5]  }
   0x7   :  { %s31_s26 = sshll.u32 %s1138_s25, 4  ;;  %s32_s26 = int_to_ptr.vmem [resolvable:$true] %s31_s26 }
   0x8   :  { %37 = dma.hbm_to_vmem [thread:$0]  %s30_s22, 2048, %s32_s26, [#allocation6], %s1136_s23, %s1136_s23, %s1137_s24  }
   0x9   :  { %1129 = dma.done.wait [#allocation3], 512  }
   0xa   :  { %1130 = vsyncadd [#allocation3], 4294966784 }
   0xb   :  { %1131 = dma.done.wait [#allocation6], 2048  }
   0xc   :  { %1132 = vsyncadd [#allocation6], 4294965248  ;;  %v69_v0 = vld [vmem:[#allocation5 + $0x78] sm:$0xff]  ;;  %v68_v1 = vld [vmem:[#allocation5 + $0x70] sm:$0xff]  ;;  %s1028_s5 = sshll.u32 %s1651_s4, 4  ;;  %s1029_s5 = int_to_ptr.hbm [resolvable:$true] %s1028_s5 }
   0xd   :  { %v67_v2 = vld [vmem:[#allocation5 + $0x68] sm:$0xff]  ;;  %v1177_v3 = vand.u32 4294901760, %v69_v0  ;;  %v1179_v4 = vand.u32 4294901760, %v68_v1  ;;  %v66_v6 = vld [vmem:[#allocation5 + $0x60] sm:$0xff]  ;;  %v65_v7 = vld [vmem:[#allocation5 + $0x58] sm:$0xff] }
   0xe   :  { %v1181_v5 = vand.u32 4294901760, %v67_v2  ;;  %v64_v8 = vld [vmem:[#allocation5 + $0x50] sm:$0xff]  ;;  %v1183_v9 = vand.u32 4294901760, %v66_v6  ;;  %v1185_v10 = vand.u32 4294901760, %v65_v7  ;;  %v63_v12 = vld [vmem:[#allocation5 + $0x48] sm:$0xff]  ;;  %v62_v13 = vld [vmem:[#allocation5 + $0x40] sm:$0xff] }
   0xf   :  { %v1187_v11 = vand.u32 4294901760, %v64_v8  ;;  %71 = vmatpush.msra.mxu0 %v1177_v3  ;;  %v1191_v14 = vsub.f32 %v69_v0, %v1177_v3  ;;  %v1194_v15 = vsub.f32 %v68_v1, %v1179_v4  ;;  %318 = vmatpush.msra.mxu3 %v1177_v3  ;;  %v1200_v17 = vand.u32 4294901760, %v63_v12  ;;  %v61_v18 = vld [vmem:[#allocation5 + $0x38] sm:$0xff]  ;;  %v60_v29 = vld [vmem:[#allocation5 + $0x30] sm:$0xff]  ;;  %v59_v36 = vld [vmem:[#allocation5 + $0x28] sm:$0xff] }
  0x10   :  { %v1198_v16 = vsub.f32 %v67_v2, %v1181_v5  ;;  %v1203_v19 = vsub.f32 %v66_v6, %v1183_v9  ;;  %v1206_v20 = vsub.f32 %v65_v7, %v1185_v10  ;;  %v1208_v21 = vand.u32 4294901760, %v62_v13  ;;  %v58_v43 = vld [vmem:[#allocation5 + $0x20] sm:$0xff]  ;;  %v57_v49 = vld [vmem:[#allocation5 + $0x18] sm:$0xff]  ;;  %v56_v55 = vld [vmem:[#allocation5 + $0x10] sm:$0xff] }
  0x11   :  { %v1211_v22 = vsub.f32 %v64_v8, %v1187_v11  ;;  %73 = vmatpush.msra.mxu0 %v1179_v4  ;;  %250 = vmatpush.msra.mxu2 %v1191_v14  ;;  %v1216_v23 = vand.u32 4294901760, %v1191_v14  ;;  %v1219_v24 = vand.u32 4294901760, %v1194_v15  ;;  %v1228_v27 = vand.u32 4294901760, %v61_v18  ;;  %v1299_v56 = vld [vmem:[#allocation2] sm:$0xff]  ;;  %v55_v62 = vld [vmem:[#allocation5 + $0x8] sm:$0xff] }
  0x12   :  { %1669 = vst [vmem:[#allocation11_spill] sm:$0xff] %v1203_v19  ;;  %v1222_v25 = vand.u32 4294901760, %v1198_v16  ;;  %320 = vmatpush.msra.mxu3 %v1179_v4  ;;  %v1226_v26 = vand.u32 4294901760, %v1203_v19  ;;  %v1231_v28 = vsub.f32 %v63_v12, %v1200_v17  ;;  %v1242_v33 = vand.u32 4294901760, %v1206_v20  ;;  %v54_v8 = vld [vmem:[#allocation5] sm:$0xff] }
  0x13   :  { %1670 = vst [vmem:[#allocation12_spill] sm:$0xff] %v1206_v20  ;;  %75 = vmatpush.msra.mxu0 %v1181_v5  ;;  %253 = vmatpush.msra.mxu2 %v1194_v15  ;;  %v138_v30 = vsub.f32 %v1191_v14, %v1216_v23  ;;  %v144_v31 = vsub.f32 %v1194_v15, %v1219_v24  ;;  %v1246_v34 = vand.u32 4294901760, %v1211_v22  ;;  %v1259_v40 = vand.u32 4294901760, %v60_v29 }
  0x14   :  { %1671 = vst [vmem:[#allocation13_spill] sm:$0xff] %v1211_v22  ;;  %v150_v32 = vsub.f32 %v1198_v16, %v1222_v25  ;;  %322 = vmatpush.msra.mxu3 %v1181_v5  ;;  %v1249_v35 = vsub.f32 %v62_v13, %v1208_v21  ;;  %v156_v39 = vsub.f32 %v1203_v19, %v1226_v26  ;;  %v1263_v41 = vand.u32 4294901760, %v1231_v28 }
  0x15   :  { %1672 = vst [vmem:[#allocation14_spill] sm:$0xff] %v1231_v28  ;;  %77 = vmatpush.msra.mxu0 %v1183_v9  ;;  %v1252_v37 = vand.u32 4294901760, %v138_v30  ;;  %256 = vmatpush.msra.mxu2 %v1198_v16  ;;  %v1255_v38 = vand.u32 4294901760, %v144_v31  ;;  %v1266_v42 = vsub.f32 %v61_v18, %v1228_v27  ;;  %v162_v45 = vsub.f32 %v1206_v20, %v1242_v33  ;;  %v1349_v30 = vld [vmem:[#allocation2 + $0x8] sm:$0xff] }
  0x16   :  { %1673 = vst [vmem:[#allocation15_spill] sm:$0xff] %v1249_v35  ;;  %324 = vmatpush.msra.mxu3 %v1183_v9  ;;  %v1270_v44 = vand.u32 4294901760, %v150_v32  ;;  %v1274_v46 = vand.u32 4294901760, %v59_v36  ;;  %v168_v47 = vsub.f32 %v1211_v22, %v1246_v34  ;;  %v1281_v48 = vand.u32 4294901760, %v1249_v35 }
  0x17   :  { %1674 = vst [vmem:[#allocation16_spill] sm:$0xff] %v1266_v42  ;;  %79 = vmatpush.msra.mxu0 %v1185_v10  ;;  %140 = vmatpush.msra.mxu1 %v1252_v37  ;;  %v1285_v50 = vand.u32 4294901760, %v156_v39  ;;  %v1287_v51 = vand.u32 4294901760, %v58_v43  ;;  %v1290_v52 = vsub.f32 %v60_v29, %v1259_v40  ;;  %v174_v53 = vsub.f32 %v1231_v28, %v1263_v41 }
  0x18   :  { %259 = vmatpush.msra.mxu2 %v1203_v19  ;;  %326 = vmatpush.msra.mxu3 %v1185_v10  ;;  %v1297_v54 = vand.u32 4294901760, %v1266_v42  ;;  %1676 = vst [vmem:[#allocation18_spill] sm:$0xff] %v1299_v56  ;;  %v1303_v57 = vand.u32 4294901760, %v162_v45  ;;  %v1305_v58 = vand.u32 4294901760, %v57_v49  ;;  %v1308_v59 = vsub.f32 %v59_v36, %v1274_v46 }
  0x19   :  { %81 = vmatpush.msra.mxu0 %v1187_v11  ;;  %146 = vmatpush.msra.mxu1 %v1255_v38  ;;  %1675 = vst [vmem:[#allocation17_spill] sm:$0xff] %v1290_v52  ;;  %v1311_v60 = vand.u32 4294901760, %v168_v47  ;;  %v180_v61 = vsub.f32 %v1249_v35, %v1281_v48  ;;  %v1318_v63 = vand.u32 4294901760, %v56_v55  ;;  %v1321_v0 = vand.u32 4294901760, %v1290_v52 }
  0x1a   :  { %262 = vmatpush.msra.mxu2 %v1206_v20  ;;  %328 = vmatpush.msra.mxu3 %v1187_v11  ;;  %1677 = vst [vmem:[#allocation19_spill] sm:$0xff] %v1308_v59  ;;  %v1324_v1 = vsub.f32 %v58_v43, %v1287_v51  ;;  %v1327_v2 = vand.u32 4294901760, %v1299_v56  ;;  %v1330_v6 = vand.u32 4294901760, %v174_v53  ;;  %v186_v7 = vsub.f32 %v1266_v42, %v1297_v54 }
  0x1b   :  { %83 = vmatpush.msra.mxu0 %v1200_v17  ;;  %152 = vmatpush.msra.mxu1 %v1270_v44  ;;  %v1337_v12 = vand.u32 4294901760, %v55_v62  ;;  %v1340_v13 = vand.u32 4294901760, %v1308_v59  ;;  %v1343_v18 = vsub.f32 %v57_v49, %v1305_v58  ;;  %1680 = vst [vmem:[#allocation22_spill] sm:$0xff] %v1349_v30  ;;  %v1352_v31 = vand.u32 4294901760, %v180_v61 }
  0x1c   :  { %265 = vmatpush.msra.mxu2 %v1211_v22  ;;  %330 = vmatpush.msra.mxu3 %v1200_v17  ;;  %1678 = vst [vmem:[#allocation20_spill] sm:$0xff] %v1324_v1  ;;  %v1347_v29 = vsub.f32 %v1299_v56, %v1327_v2  ;;  %v192_v32 = vsub.f32 %v1290_v52, %v1321_v0  ;;  %v1359_v36 = vand.u32 4294901760, %v54_v8  ;;  %v1362_v39 = vand.u32 4294901760, %v1324_v1 }
  0x1d   :  { %85 = vmatpush.msra.mxu0 %v1208_v21  ;;  %158 = vmatpush.msra.mxu1 %v1285_v50  ;;  %1679 = vst [vmem:[#allocation21_spill] sm:$0xff] %v1343_v18  ;;  %v1365_v43 = vsub.f32 %v56_v55, %v1318_v63  ;;  %v1371_v47 = vand.u32 4294901760, %v1349_v30  ;;  %v1375_v49 = vand.u32 4294901760, %v186_v7  ;;  %v198_v53 = vsub.f32 %v1308_v59, %v1340_v13 }
  0x1e   :  { %268 = vmatpush.msra.mxu2 %v1231_v28  ;;  %332 = vmatpush.msra.mxu3 %v1208_v21  ;;  %v104_v45 = vand.u32 4294901760, %v1347_v29  ;;  %v1380_v55 = vand.u32 4294901760, %v1343_v18  ;;  %v1383_v61 = vsub.f32 %v55_v62, %v1337_v12  ;;  %v1389_v56 = vand.u32 4294901760, %v192_v32 }
  0x1f   :  { %87 = vmatpush.msra.mxu0 %v1228_v27  ;;  %164 = vmatpush.msra.mxu1 %v1303_v57  ;;  %1681 = vst [vmem:[#allocation23_spill] sm:$0xff] %v1365_v43  ;;  %v204_v7 = vsub.f32 %v1324_v1, %v1362_v39  ;;  %v1408_v32 = vand.u32 4294901760, %v198_v53 }
  0x20   :  { %271 = vmatpush.msra.mxu2 %v1249_v35  ;;  %334 = vmatpush.msra.mxu3 %v1228_v27  ;;  %1682 = vst [vmem:[#allocation24_spill] sm:$0xff] %v1389_v56  ;;  %v1397_v35 = vsub.f32 %v54_v8, %v1359_v36  ;;  %v105_v62 = vsub.f32 %v1347_v29, %v104_v45  ;;  %v1413_v28 = vand.u32 4294901760, %v1383_v61 }
  0x21   :  { %89 = vmatpush.msra.mxu0 %v1259_v40  ;;  %170 = vmatpush.msra.mxu1 %v1311_v60  ;;  %1683 = vst [vmem:[#allocation25_spill] sm:$0xff] %v1408_v32  ;;  %v210_v8 = vsub.f32 %v1343_v18, %v1380_v55 }
  0x22   :  { %274 = vmatpush.msra.mxu2 %v1266_v42  ;;  %336 = vmatpush.msra.mxu3 %v1259_v40  ;;  %v1394_v42 = vand.u32 4294901760, %v1365_v43  ;;  %v1426_v22 = vand.u32 4294901760, %v1397_v35  ;;  %v106_v20 = vand.u32 4294901760, %v105_v62 }
  0x23   :  { %91 = vmatpush.msra.mxu0 %v1274_v46  ;;  %176 = vmatpush.msra.mxu1 %v1330_v6 }
  0x24   :  { %277 = vmatpush.msra.mxu2 %v1290_v52  ;;  %338 = vmatpush.msra.mxu3 %v1274_v46  ;;  %v1404_v52 = vsub.f32 %v1349_v30, %v1371_v47  ;;  %v1421_v30 = vand.u32 4294901760, %v204_v7  ;;  %v216_v53 = vsub.f32 %v1365_v43, %v1394_v42  ;;  %v1436_v7 = vand.u32 4294901760, %v210_v8 }
  0x25   :  { %93 = vmatpush.msra.mxu0 %v1287_v51  ;;  %182 = vmatpush.msra.mxu1 %v1352_v31 }
  0x26   :  { %280 = vmatpush.msra.mxu2 %v1308_v59  ;;  %340 = vmatpush.msra.mxu3 %v1287_v51  ;;  %v1415_v59 = vld [vmem:[#allocation2 + $0x10] sm:$0xff]  ;;  %1685 = vst [vmem:[#allocation27_spill] sm:$0xff] %v1421_v30  ;;  %v1444_v62 = vand.u32 4294901760, %v216_v53 }
  0x27   :  { %95 = vmatpush.msra.mxu0 %v1305_v58  ;;  %188 = vmatpush.msra.mxu1 %v1375_v49  ;;  %1684 = vst [vmem:[#allocation26_spill] sm:$0xff] %v1415_v59  ;;  %v1432_v19 = vand.u32 4294901760, %v1415_v59 }
  0x28   :  { %283 = vmatpush.msra.mxu2 %v1324_v1  ;;  %342 = vmatpush.msra.mxu3 %v1305_v58  ;;  %v112_v1 = vand.u32 4294901760, %v1404_v52 }
  0x29   :  { %97 = vmatpush.msra.mxu0 %v1318_v63  ;;  %194 = vmatpush.msra.mxu1 %v1389_v56  ;;  %v222_v56 = vsub.f32 %v1383_v61, %v1413_v28 }
  0x2a   :  { %286 = vmatpush.msra.mxu2 %v1343_v18  ;;  %344 = vmatpush.msra.mxu3 %v1318_v63  ;;  %v228_v18 = vsub.f32 %v1397_v35, %v1426_v22  ;;  %v113_v8 = vsub.f32 %v1404_v52, %v112_v1 }
  0x2b   :  { %99 = vmatpush.msra.mxu0 %v1337_v12  ;;  %200 = vmatpush.msra.mxu1 %v1408_v32  ;;  %v119_v32 = vsub.f32 %v1415_v59, %v1432_v19 }
  0x2c   :  { %289 = vmatpush.msra.mxu2 %v1365_v43  ;;  %346 = vmatpush.msra.mxu3 %v1337_v12  ;;  %v1454_v43 = vand.u32 4294901760, %v222_v56  ;;  %v114_v53 = vand.u32 4294901760, %v113_v8 }
  0x2d   :  { %101 = vmatpush.msra.mxu0 %v1359_v36  ;;  %206 = vmatpush.msra.mxu1 %v1421_v30  ;;  %v1456_v30 = vld [vmem:[#allocation2 + $0x18] sm:$0xff]  ;;  %v120_v59 = vand.u32 4294901760, %v119_v32 }
  0x2e   :  { %107 = vmatmul.f32.vlgmr.msra.gmra.mxu0 %v106_v20  ;;  %292 = vmatpush.msra.mxu2 %v1383_v61  ;;  %v1462_v20 = vand.u32 4294901760, %v228_v18  ;;  %v1466_v56 = vand.u32 4294901760, %v1456_v30 }
  0x2f   :  { %212 = vmatpush.msra.mxu1 %v1436_v7  ;;  %377 = vmatpush.msrb.mxu0 %v1216_v23  ;;  %v121_v18 = vsub.f32 %v119_v32, %v120_v59 }
  0x30   :  { %295 = vmatpush.msra.mxu2 %v1397_v35  ;;  %348 = vmatpush.msra.mxu3 %v1359_v36 }
  0x31   :  { %218 = vmatpush.msra.mxu1 %v1444_v62  ;;  %381 = vmatpush.msrb.mxu0 %v1219_v24 }
  0x32   :  { %298 = vmatmul.f32.vlgmr.msra.gmra.mxu2 %v1347_v29  ;;  %352 = vmatmul.f32.vlgmr.msra.gmra.mxu3 %v104_v45  ;;  %v127_v29 = vsub.f32 %v1456_v30, %v1466_v56 }
  0x33   :  { %224 = vmatpush.msra.mxu1 %v1454_v43  ;;  %385 = vmatpush.msrb.mxu0 %v1222_v25 }
  0x34   :  { %586 = vmatpush.msrb.mxu3 %v1252_v37  ;;  %517 = vmatpush.msrb.mxu2 %v1177_v3  ;;  %v122_v37 = vand.u32 4294901760, %v121_v18  ;;  %v128_v45 = vand.u32 4294901760, %v127_v29 }
  0x35   :  { %230 = vmatpush.msra.mxu1 %v1462_v20  ;;  %389 = vmatpush.msrb.mxu0 %v1226_v26 }
  0x36   :  { %115 = vmatmul.f32.gmra.mxu0 %v114_v53  ;;  %232 = vmatmul.f32.vlgmr.msra.gmra.mxu1 %v1327_v2 }
  0x37   :  { %456 = vmatpush.msrb.mxu1 %v1177_v3  ;;  %393 = vmatpush.msrb.mxu0 %v1242_v33 }
  0x38   :  { %592 = vmatpush.msrb.mxu3 %v1255_v38  ;;  %519 = vmatpush.msrb.mxu2 %v1179_v4  ;;  %v129_v38 = vsub.f32 %v127_v29, %v128_v45 }
  0x39   :  { %458 = vmatpush.msrb.mxu1 %v1179_v4  ;;  %397 = vmatpush.msrb.mxu0 %v1246_v34 }
  0x3a   :  { %303 = vmatmul.f32.gmra.mxu2 %v1404_v52  ;;  %358 = vmatmul.f32.gmra.mxu3 %v112_v1  ;;  %v1689_v52 = vld [vmem:[#allocation25_spill] sm:$0xff]  ;;  %v1694_v1 = vld [vmem:[#allocation16_spill] sm:$0xff] }
  0x3b   :  { %460 = vmatpush.msrb.mxu1 %v1181_v5  ;;  %401 = vmatpush.msrb.mxu0 %v1263_v41 }
  0x3c   :  { %598 = vmatpush.msrb.mxu3 %v1270_v44  ;;  %521 = vmatpush.msrb.mxu2 %v1181_v5  ;;  %v130_v44 = vand.u32 4294901760, %v129_v38 }
  0x3d   :  { %462 = vmatpush.msrb.mxu1 %v1183_v9  ;;  %405 = vmatpush.msrb.mxu0 %v1281_v48 }
  0x3e   :  { %123 = vmatmul.f32.gmra.mxu0 %v122_v37  ;;  %236 = vmatmul.f32.gmra.mxu1 %v1371_v47 }
  0x3f   :  { %464 = vmatpush.msrb.mxu1 %v1185_v10  ;;  %409 = vmatpush.msrb.mxu0 %v1297_v54 }
  0x40   :  { %604 = vmatpush.msrb.mxu3 %v1285_v50  ;;  %523 = vmatpush.msrb.mxu2 %v1183_v9  ;;  %v1686_v50 = vld [vmem:[#allocation24_spill] sm:$0xff] }
  0x41   :  { %466 = vmatpush.msrb.mxu1 %v1187_v11  ;;  %413 = vmatpush.msrb.mxu0 %v1321_v0 }
  0x42   :  { %308 = vmatmul.f32.gmra.mxu2 %v119_v32  ;;  %364 = vmatmul.f32.gmra.mxu3 %v120_v59  ;;  %v1692_v59 = vld [vmem:[#allocation14_spill] sm:$0xff] }
  0x43   :  { %468 = vmatpush.msrb.mxu1 %v1200_v17  ;;  %417 = vmatpush.msrb.mxu0 %v1340_v13 }
  0x44   :  { %610 = vmatpush.msrb.mxu3 %v1303_v57  ;;  %525 = vmatpush.msrb.mxu2 %v1185_v10  ;;  %v1691_v57 = vld [vmem:[#allocation27_spill] sm:$0xff] }
  0x45   :  { %470 = vmatpush.msrb.mxu1 %v1208_v21  ;;  %421 = vmatpush.msrb.mxu0 %v1362_v39 }
  0x46   :  { %131 = vmatmul.f32.gmra.mxu0 %v130_v44  ;;  %240 = vmatmul.f32.gmra.mxu1 %v1432_v19 }
  0x47   :  { %472 = vmatpush.msrb.mxu1 %v1228_v27  ;;  %425 = vmatpush.msrb.mxu0 %v1380_v55 }
  0x48   :  { %616 = vmatpush.msrb.mxu3 %v1311_v60  ;;  %527 = vmatpush.msrb.mxu2 %v1187_v11  ;;  %v1693_v60 = vld [vmem:[#allocation15_spill] sm:$0xff] }
  0x49   :  { %474 = vmatpush.msrb.mxu1 %v1259_v40  ;;  %429 = vmatpush.msrb.mxu0 %v1394_v42 }
  0x4a   :  { %313 = vmatmul.f32.gmra.mxu2 %v127_v29  ;;  %370 = vmatmul.f32.gmra.mxu3 %v128_v45 }
  0x4b   :  { %476 = vmatpush.msrb.mxu1 %v1274_v46  ;;  %433 = vmatpush.msrb.mxu0 %v1413_v28 }
  0x4c   :  { %622 = vmatpush.msrb.mxu3 %v1330_v6  ;;  %529 = vmatpush.msrb.mxu2 %v1200_v17  ;;  %v1696_v6 = vld [vmem:[#allocation19_spill] sm:$0xff] }
  0x4d   :  { %478 = vmatpush.msrb.mxu1 %v1287_v51  ;;  %437 = vmatpush.msrb.mxu0 %v1426_v22 }
  0x4e   :  { %244 = vmatmul.f32.gmra.mxu1 %v1466_v56  ;;  %439 = vmatmul.f32.vlgmr.msrb.gmra.mxu0 %v1327_v2 }
  0x4f   :  { %480 = vmatpush.msrb.mxu1 %v1305_v58  ;;  %696 = vmatpush.msra.mxu0 %v1191_v14  ;;  %v1687_v14 = vld [vmem:[#allocation11_spill] sm:$0xff] }
  0x50   :  { %628 = vmatpush.msrb.mxu3 %v1352_v31  ;;  %531 = vmatpush.msrb.mxu2 %v1208_v21  ;;  %v1697_v31 = vld [vmem:[#allocation20_spill] sm:$0xff] }
  0x51   :  { %482 = vmatpush.msrb.mxu1 %v1318_v63  ;;  %699 = vmatpush.msra.mxu0 %v1194_v15  ;;  %v1688_v15 = vld [vmem:[#allocation12_spill] sm:$0xff] }
  0x52   :  { %634 = vmatpush.msrb.mxu3 %v1375_v49  ;;  %533 = vmatpush.msrb.mxu2 %v1228_v27 }
  0x53   :  { %484 = vmatpush.msrb.mxu1 %v1337_v12  ;;  %702 = vmatpush.msra.mxu0 %v1198_v16  ;;  %v1690_v16 = vld [vmem:[#allocation13_spill] sm:$0xff] }
  0x54   :  { %640 = vmatpush.msrb.mxu3 %v1686_v50  ;;  %535 = vmatpush.msrb.mxu2 %v1259_v40 }
  0x55   :  { %486 = vmatpush.msrb.mxu1 %v1359_v36  ;;  %705 = vmatpush.msra.mxu0 %v1687_v14 }
  0x56   :  { %443 = vmatmul.f32.gmra.mxu0 %v1371_v47  ;;  %488 = vmatmul.f32.vlgmr.msrb.gmra.mxu1 %v1327_v2  ;;  %v1695_v2 = vld [vmem:[#allocation17_spill] sm:$0xff] }
  0x57   :  { %764 = vmatpush.msra.mxu1 %v1177_v3  ;;  %708 = vmatpush.msra.mxu0 %v1688_v15 }
  0x58   :  { %646 = vmatpush.msrb.mxu3 %v1689_v52  ;;  %537 = vmatpush.msrb.mxu2 %v1274_v46 }
  0x59   :  { %766 = vmatpush.msra.mxu1 %v1179_v4  ;;  %711 = vmatpush.msra.mxu0 %v1690_v16 }
  0x5a   :  { %652 = vmatpush.msrb.mxu3 %v1691_v57  ;;  %539 = vmatpush.msrb.mxu2 %v1287_v51 }
  0x5b   :  { %768 = vmatpush.msra.mxu1 %v1181_v5  ;;  %714 = vmatpush.msra.mxu0 %v1692_v59 }
  0x5c   :  { %658 = vmatpush.msrb.mxu3 %v1436_v7  ;;  %541 = vmatpush.msrb.mxu2 %v1305_v58 }
  0x5d   :  { %770 = vmatpush.msra.mxu1 %v1183_v9  ;;  %717 = vmatpush.msra.mxu0 %v1693_v60 }
  0x5e   :  { %447 = vmatmul.f32.gmra.mxu0 %v1432_v19  ;;  %492 = vmatmul.f32.gmra.mxu1 %v1371_v47  ;;  %v1699_v47 = vld [vmem:[#allocation23_spill] sm:$0xff] }
  0x5f   :  { %772 = vmatpush.msra.mxu1 %v1185_v10  ;;  %720 = vmatpush.msra.mxu0 %v1694_v1  ;;  %v1702_v1 = vld [vmem:[#allocation26_spill] sm:$0xff] }
  0x60   :  { %664 = vmatpush.msrb.mxu3 %v1444_v62  ;;  %543 = vmatpush.msrb.mxu2 %v1318_v63 }
  0x61   :  { %774 = vmatpush.msra.mxu1 %v1187_v11  ;;  %723 = vmatpush.msra.mxu0 %v1695_v2 }
  0x62   :  { %670 = vmatpush.msrb.mxu3 %v1454_v43  ;;  %545 = vmatpush.msrb.mxu2 %v1337_v12  ;;  %v1698_v43 = vld [vmem:[#allocation21_spill] sm:$0xff] }
  0x63   :  { %776 = vmatpush.msra.mxu1 %v1200_v17  ;;  %726 = vmatpush.msra.mxu0 %v1696_v6 }
  0x64   :  { %676 = vmatpush.msrb.mxu3 %v1462_v20  ;;  %547 = vmatpush.msrb.mxu2 %v1359_v36  ;;  %v1701_v20 = vld [vmem:[#allocation22_spill] sm:$0xff] }
  0x65   :  { %778 = vmatpush.msra.mxu1 %v1208_v21  ;;  %729 = vmatpush.msra.mxu0 %v1697_v31 }
  0x66   :  { %451 = vmatmul.f32.gmra.mxu0 %v1466_v56  ;;  %496 = vmatmul.f32.gmra.mxu1 %v1432_v19 }
  0x67   :  { %780 = vmatpush.msra.mxu1 %v1228_v27  ;;  %732 = vmatpush.msra.mxu0 %v1698_v43 }
  0x68   :  { %902 = vmatpush.msra.mxu3 %v1177_v3  ;;  %823 = vmatpush.msra.mxu2 %v1216_v23 }
  0x69   :  { %782 = vmatpush.msra.mxu1 %v1259_v40  ;;  %735 = vmatpush.msra.mxu0 %v1699_v47 }
  0x6a   :  { %904 = vmatpush.msra.mxu3 %v1179_v4  ;;  %827 = vmatpush.msra.mxu2 %v1219_v24 }
  0x6b   :  { %784 = vmatpush.msra.mxu1 %v1274_v46  ;;  %738 = vmatpush.msra.mxu0 %v1383_v61 }
  0x6c   :  { %906 = vmatpush.msra.mxu3 %v1181_v5  ;;  %831 = vmatpush.msra.mxu2 %v1222_v25 }
  0x6d   :  { %786 = vmatpush.msra.mxu1 %v1287_v51  ;;  %741 = vmatpush.msra.mxu0 %v1397_v35 }
  0x6e   :  { %500 = vmatmul.f32.gmra.mxu1 %v1466_v56  ;;  %908 = vmatpush.msra.mxu3 %v1183_v9 }
  0x6f   :  { %788 = vmatpush.msra.mxu1 %v1305_v58  ;;  %835 = vmatpush.msra.mxu2 %v1226_v26 }
  0x70   :  { %910 = vmatpush.msra.mxu3 %v1185_v10 }
  0x71   :  { %790 = vmatpush.msra.mxu1 %v1318_v63  ;;  %839 = vmatpush.msra.mxu2 %v1242_v33 }
  0x72   :  { %912 = vmatpush.msra.mxu3 %v1187_v11 }
  0x73   :  { %792 = vmatpush.msra.mxu1 %v1337_v12  ;;  %843 = vmatpush.msra.mxu2 %v1246_v34 }
  0x74   :  { %914 = vmatpush.msra.mxu3 %v1200_v17 }
  0x75   :  { %794 = vmatpush.msra.mxu1 %v1359_v36  ;;  %847 = vmatpush.msra.mxu2 %v1263_v41 }
  0x76   :  { %916 = vmatpush.msra.mxu3 %v1208_v21 }
  0x77   :  { %851 = vmatpush.msra.mxu2 %v1281_v48 }
  0x78   :  { %918 = vmatpush.msra.mxu3 %v1228_v27 }
  0x79   :  { %855 = vmatpush.msra.mxu2 %v1297_v54 }
  0x7a   :  { %920 = vmatpush.msra.mxu3 %v1259_v40 }
  0x7b   :  { %859 = vmatpush.msra.mxu2 %v1321_v0 }
  0x7c   :  { %922 = vmatpush.msra.mxu3 %v1274_v46 }
  0x7d   :  { %863 = vmatpush.msra.mxu2 %v1340_v13 }
  0x7e   :  { %924 = vmatpush.msra.mxu3 %v1287_v51 }
  0x7f   :  { %867 = vmatpush.msra.mxu2 %v1362_v39 }
  0x80   :  { %926 = vmatpush.msra.mxu3 %v1305_v58  ;;  %v1700_v58 = vld [vmem:[#allocation18_spill] sm:$0xff] }
  0x81   :  { %871 = vmatpush.msra.mxu2 %v1380_v55 }
  0x82   :  { %928 = vmatpush.msra.mxu3 %v1318_v63 }
  0x83   :  { %875 = vmatpush.msra.mxu2 %v1394_v42 }
  0x84   :  { %930 = vmatpush.msra.mxu3 %v1337_v12 }
  0x85   :  { %879 = vmatpush.msra.mxu2 %v1413_v28 }
  0x86   :  { %932 = vmatpush.msra.mxu3 %v1359_v36 }
  0x87   :  { %883 = vmatpush.msra.mxu2 %v1426_v22 }
  0xab   :  { %v108_v3 = vpop.f32.mrf.mxu0 }
  0xb3   :  { %v116_v4 = vpop.f32.mrf.mxu0  ;;  %v233_v5 = vpop.f32.mrf.mxu1 }
  0xb4   :  { %v234_v23 = vadd.f32 %v233_v5, %v108_v3 }
  0xb5   :  { %v299_v11 = vpop.f32.mrf.mxu2  ;;  %v353_v21 = vpop.f32.mrf.mxu3 }
  0xb6   :  { %v300_v26 = vadd.f32 %v299_v11, %v234_v23 }
  0xb8   :  { %v354_v33 = vadd.f32 %v353_v21, %v300_v26 }
  0xbb   :  { %v124_v9 = vpop.f32.mrf.mxu0  ;;  %v237_v10 = vpop.f32.mrf.mxu1 }
  0xbc   :  { %v238_v28 = vadd.f32 %v237_v10, %v116_v4 }
  0xbd   :  { %v304_v27 = vpop.f32.mrf.mxu2  ;;  %v359_v34 = vpop.f32.mrf.mxu3 }
  0xbe   :  { %v305_v41 = vadd.f32 %v304_v27, %v238_v28 }
  0xc0   :  { %v360_v51 = vadd.f32 %v359_v34, %v305_v41 }
  0xc3   :  { %v132_v17 = vpop.f32.mrf.mxu0  ;;  %v241_v19 = vpop.f32.mrf.mxu1 }
  0xc4   :  { %v242_v54 = vadd.f32 %v241_v19, %v124_v9 }
  0xc5   :  { %v309_v48 = vpop.f32.mrf.mxu2  ;;  %v365_v13 = vpop.f32.mrf.mxu3 }
  0xc6   :  { %v310_v39 = vadd.f32 %v309_v48, %v242_v54 }
  0xc8   :  { %v366_v62 = vadd.f32 %v365_v13, %v310_v39 }
  0xcb   :  { %v245_v24 = vpop.f32.mrf.mxu1  ;;  %v440_v25 = vpop.f32.mrf.mxu0 }
  0xcc   :  { %v441_v35 = vadd.f32 %v440_v25, %v354_v33  ;;  %v246_v8 = vadd.f32 %v245_v24, %v132_v17 }
  0xcd   :  { %v314_v18 = vpop.f32.mrf.mxu2  ;;  %v371_v52 = vpop.f32.mrf.mxu3 }
  0xce   :  { %v315_v44 = vadd.f32 %v314_v18, %v246_v8 }
  0xd0   :  { %v372_v60 = vadd.f32 %v371_v52, %v315_v44 }
  0xd3   :  { %v444_v40 = vpop.f32.mrf.mxu0  ;;  %v489_v22 = vpop.f32.mrf.mxu1 }
  0xd4   :  { %v490_v42 = vadd.f32 %v489_v22, %v441_v35  ;;  %v445_v0 = vadd.f32 %v444_v40, %v360_v51 }
  0xd6   :  { %v504_v46 = vmul.f32 0.03125, %v490_v42 }
  0xd8   :  { %v1612_v63 = vsub.f32 %v1700_v58, %v504_v46 }
  0xda   :  { %v512_v12 = vmul.f32 %v1612_v63, %v1612_v63 }
  0xdb   :  { %v493_v36 = vpop.f32.mrf.mxu1  ;;  %v448_v61 = vpop.f32.mrf.mxu0 }
  0xdc   :  { %v548_v49 = vand.u32 4294901760, %v512_v12  ;;  %v494_v55 = vadd.f32 %v493_v36, %v445_v0  ;;  %v449_v29 = vadd.f32 %v448_v61, %v366_v62 }
  0xde   :  { %v549_v32 = vsub.f32 %v512_v12, %v548_v49  ;;  %v505_v7 = vmul.f32 0.03125, %v494_v55  ;;  %678 = vmatmul.f32.vlgmr.msrb.gmra.mxu3 %v548_v49 }
  0xe0   :  { %v1617_v53 = vsub.f32 %v1701_v20, %v505_v7  ;;  %744 = vmatmul.f32.vlgmr.msra.gmra.mxu0 %v549_v32  ;;  %v550_v56 = vand.u32 4294901760, %v549_v32 }
  0xe2   :  { %v513_v37 = vmul.f32 %v1617_v53, %v1617_v53  ;;  %798 = vmatmul.f32.vlgmr.msra.gmra.mxu1 %v550_v56  ;;  %v551_v45 = vsub.f32 %v549_v32, %v550_v56 }
  0xe3   :  { %v497_v38 = vpop.f32.mrf.mxu1  ;;  %v452_v59 = vpop.f32.mrf.mxu0 }
  0xe4   :  { %v556_v50 = vand.u32 4294901760, %v513_v37  ;;  %v498_v14 = vadd.f32 %v497_v38, %v449_v29  ;;  %v552_v15 = vand.u32 4294901760, %v551_v45  ;;  %v453_v31 = vadd.f32 %v452_v59, %v372_v60 }
  0xe6   :  { %v506_v16 = vmul.f32 0.03125, %v498_v14  ;;  %553 = vmatmul.f32.vlgmr.msrb.gmra.mxu2 %v552_v15  ;;  %682 = vmatmul.f32.gmra.mxu3 %v556_v50  ;;  %v557_v57 = vsub.f32 %v513_v37, %v556_v50 }
  0xe8   :  { %v1622_v2 = vsub.f32 %v1702_v1, %v506_v16  ;;  %749 = vmatmul.f32.gmra.mxu0 %v557_v57  ;;  %v558_v6 = vand.u32 4294901760, %v557_v57 }
  0xea   :  { %v514_v43 = vmul.f32 %v1622_v2, %v1622_v2  ;;  %804 = vmatmul.f32.gmra.mxu1 %v558_v6  ;;  %v559_v47 = vsub.f32 %v557_v57, %v558_v6 }
  0xeb   :  { %v501_v3 = vpop.f32.mrf.mxu1 }
  0xec   :  { %v564_v4 = vand.u32 4294901760, %v514_v43  ;;  %v502_v5 = vadd.f32 %v501_v3, %v453_v31  ;;  %v560_v9 = vand.u32 4294901760, %v559_v47 }
  0xee   :  { %v507_v10 = vmul.f32 0.03125, %v502_v5  ;;  %561 = vmatmul.f32.gmra.mxu2 %v560_v9  ;;  %686 = vmatmul.f32.gmra.mxu3 %v564_v4  ;;  %v565_v11 = vsub.f32 %v514_v43, %v564_v4 }
  0xf0   :  { %v1627_v17 = vsub.f32 %v1456_v30, %v507_v10  ;;  %754 = vmatmul.f32.gmra.mxu0 %v565_v11  ;;  %v566_v19 = vand.u32 4294901760, %v565_v11 }
  0xf2   :  { %v515_v21 = vmul.f32 %v1627_v17, %v1627_v17  ;;  %810 = vmatmul.f32.gmra.mxu1 %v566_v19  ;;  %v567_v23 = vsub.f32 %v565_v11, %v566_v19 }
  0xf4   :  { %v572_v24 = vand.u32 4294901760, %v515_v21  ;;  %v568_v25 = vand.u32 4294901760, %v567_v23 }
  0xf6   :  { %569 = vmatmul.f32.gmra.mxu2 %v568_v25  ;;  %690 = vmatmul.f32.gmra.mxu3 %v572_v24  ;;  %v573_v26 = vsub.f32 %v515_v21, %v572_v24  ;;  %v1047_v25 = vld [vmem:[%s1649_s2] ss:$0 sm:$0xff]  ;;  %s1139_s2 = smov [#allocation7]  }
  0xf8   :  { %759 = vmatmul.f32.gmra.mxu0 %v573_v26  ;;  %v574_v27 = vand.u32 4294901760, %v573_v26 }
  0xfa   :  { %816 = vmatmul.f32.gmra.mxu1 %v574_v27  ;;  %v575_v33 = vsub.f32 %v573_v26, %v574_v27 }
  0xfc   :  { %v576_v28 = vand.u32 4294901760, %v575_v33 }
  0xfe   :  { %577 = vmatmul.f32.gmra.mxu2 %v576_v28  ;;  %934 = vmatmul.f32.vlgmr.msra.gmra.mxu3 %v548_v49 }
 0x106   :  { %885 = vmatmul.f32.vlgmr.msra.gmra.mxu2 %v548_v49  ;;  %938 = vmatmul.f32.gmra.mxu3 %v556_v50 }
 0x10e   :  { %889 = vmatmul.f32.gmra.mxu2 %v556_v50  ;;  %942 = vmatmul.f32.gmra.mxu3 %v564_v4 }
 0x116   :  { %893 = vmatmul.f32.gmra.mxu2 %v564_v4  ;;  %946 = vmatmul.f32.gmra.mxu3 %v572_v24 }
 0x11e   :  { %897 = vmatmul.f32.gmra.mxu2 %v572_v24 }
 0x15d   :  { %v745_v46 = vpop.f32.mrf.mxu0 }
 0x15f   :  { %v799_v51 = vpop.f32.mrf.mxu1 }
 0x161   :  { %v679_v30 = vpop.f32.mrf.mxu3 }
 0x165   :  { %v750_v12 = vpop.f32.mrf.mxu0 }
 0x167   :  { %v805_v55 = vpop.f32.mrf.mxu1 }
 0x169   :  { %v554_v34 = vpop.f32.mrf.mxu2  ;;  %v683_v35 = vpop.f32.mrf.mxu3 }
 0x16a   :  { %v680_v48 = vadd.f32 %v679_v30, %v554_v34 }
 0x16c   :  { %v746_v58 = vadd.f32 %v745_v46, %v680_v48 }
 0x16d   :  { %v755_v18 = vpop.f32.mrf.mxu0 }
 0x16e   :  { %v800_v36 = vadd.f32 %v799_v51, %v746_v58 }
 0x16f   :  { %v811_v44 = vpop.f32.mrf.mxu1 }
 0x171   :  { %v562_v40 = vpop.f32.mrf.mxu2  ;;  %v687_v22 = vpop.f32.mrf.mxu3 }
 0x172   :  { %v684_v13 = vadd.f32 %v683_v35, %v562_v40  ;;  %v1048_v35 = vld [vmem:[%s1650_s3] ss:$0 sm:$0xff]  ;;  %s1026_s3 = sshll.u32 %s1139_s2, 4  ;;  %s1027_s3 = int_to_ptr.vmem [resolvable:$true] %s1026_s3 }
 0x174   :  { %v751_v61 = vadd.f32 %v750_v12, %v684_v13 }
 0x175   :  { %v760_v6 = vpop.f32.mrf.mxu0 }
 0x176   :  { %v806_v56 = vadd.f32 %v805_v55, %v751_v61 }
 0x177   :  { %v817_v5 = vpop.f32.mrf.mxu1 }
 0x179   :  { %v570_v41 = vpop.f32.mrf.mxu2  ;;  %v691_v42 = vpop.f32.mrf.mxu3 }
 0x17a   :  { %v688_v8 = vadd.f32 %v687_v22, %v570_v41 }
 0x17c   :  { %v756_v45 = vadd.f32 %v755_v18, %v688_v8 }
 0x17e   :  { %v812_v16 = vadd.f32 %v811_v44, %v756_v45 }
 0x181   :  { %v578_v54 = vpop.f32.mrf.mxu2  ;;  %v935_v0 = vpop.f32.mrf.mxu3 }
 0x182   :  { %v692_v15 = vadd.f32 %v691_v42, %v578_v54 }
 0x184   :  { %v761_v43 = vadd.f32 %v760_v6, %v692_v15 }
 0x186   :  { %v818_v19 = vadd.f32 %v817_v5, %v761_v43 }
 0x189   :  { %v886_v39 = vpop.f32.mrf.mxu2  ;;  %v939_v62 = vpop.f32.mrf.mxu3 }
 0x18a   :  { %v887_v49 = vadd.f32 %v886_v39, %v800_v36 }
 0x18c   :  { %v936_v32 = vadd.f32 %v935_v0, %v887_v49 }
 0x18e   :  { %v950_v7 = vmul.f32 0.03125, %v936_v32 }
 0x190   :  { %v954_v20 = vadd.f32 1e-06, %v950_v7 }
 0x191   :  { %v890_v29 = vpop.f32.mrf.mxu2  ;;  %v943_v59 = vpop.f32.mrf.mxu3 }
 0x192   :  { %1049 = vrsqrt.f32 %v954_v20  ;;  %v891_v37 = vadd.f32 %v890_v29, %v806_v56  ;;  %vm964_vm1 = vweird.f32 %v954_v20 }
 0x194   :  { %v940_v38 = vadd.f32 %v939_v62, %v891_v37 }
 0x196   :  { %v951_v50 = vmul.f32 0.03125, %v940_v38 }
 0x198   :  { %v1050_v14 = vpop.eup %1049  ;;  %v955_v52 = vadd.f32 1e-06, %v951_v50 }
 0x199   :  { %v959_v57 = vmul.f32 %v1050_v14, %v954_v20  ;;  %v894_v60 = vpop.f32.mrf.mxu2  ;;  %vm965_vm0 = vweird.f32 %v1050_v14  ;;  %v947_v28 = vpop.f32.mrf.mxu3 }
 0x19a   :  { %1051 = vrsqrt.f32 %v955_v52  ;;  %v895_v1 = vadd.f32 %v894_v60, %v812_v16  ;;  %vm966_vm2 = vmor %vm964_vm1, %vm965_vm0  ;;  %vm974_vm4 = vweird.f32 %v955_v52 }
 0x19b   :  { %v960_v31 = vmul.f32 %v1050_v14, %v959_v57 }
 0x19c   :  { %v944_v47 = vadd.f32 %v943_v59, %v895_v1 }
 0x19d   :  { %v961_v3 = vmul.f32 0.5, %v960_v31 }
 0x19e   :  { %v952_v4 = vmul.f32 0.03125, %v944_v47 }
 0x19f   :  { %v962_v9 = vsub.f32 1.5, %v961_v3 }
 0x1a0   :  { %v1052_v10 = vpop.eup %1051  ;;  %v956_v11 = vadd.f32 1e-06, %v952_v4 }
 0x1a1   :  { %v963_v21 = vmul.f32 %v1050_v14, %v962_v9  ;;  %v969_v23 = vmul.f32 %v1052_v10, %v955_v52  ;;  %v898_v24 = vpop.f32.mrf.mxu2  ;;  %vm975_vm3 = vweird.f32 %v1052_v10 }
 0x1a2   :  { %1053 = vrsqrt.f32 %v956_v11  ;;  %v899_v26 = vadd.f32 %v898_v24, %v818_v19  ;;  %vm976_vm5 = vmor %vm974_vm4, %vm975_vm3  ;;  %vm984_vm7 = vweird.f32 %v956_v11 }
 0x1a3   :  { %v967_v27 = vsel %vm966_vm2, %v1050_v14, %v963_v21  ;;  %v970_v33 = vmul.f32 %v1052_v10, %v969_v23 }
 0x1a4   :  { %v1000_v30 = vmul.f32 %v967_v27, %v1612_v63  ;;  %v948_v34 = vadd.f32 %v947_v28, %v899_v26 }
 0x1a5   :  { %v971_v40 = vmul.f32 0.5, %v970_v33 }
 0x1a6   :  { %v1007_v22 = vmul.f32 %v1047_v25, %v1000_v30  ;;  %v953_v41 = vmul.f32 0.03125, %v948_v34 }
 0x1a7   :  { %v972_v42 = vsub.f32 1.5, %v971_v40 }
 0x1a8   :  { %v1054_v46 = vpop.eup %1053  ;;  %v957_v48 = vadd.f32 1e-06, %v953_v41  ;;  %v1014_v51 = vadd.f32 %v1048_v35, %v1007_v22 }
 0x1a9   :  { %v973_v54 = vmul.f32 %v1052_v10, %v972_v42  ;;  %v979_v58 = vmul.f32 %v1054_v46, %v956_v11  ;;  %vm985_vm6 = vweird.f32 %v1054_v46 }
 0x1aa   :  { %1055 = vrsqrt.f32 %v957_v48  ;;  %1018 = vst [vmem:[#allocation7] sm:$0xff] %v1014_v51  ;;  %vm986_vm8 = vmor %vm984_vm7, %vm985_vm6  ;;  %vm994_vm10 = vweird.f32 %v957_v48 }
 0x1ab   :  { %v977_v63 = vsel %vm976_vm5, %v1052_v10, %v973_v54  ;;  %v980_v0 = vmul.f32 %v1054_v46, %v979_v58 }
 0x1ac   :  { %v1001_v12 = vmul.f32 %v977_v63, %v1617_v53 }
 0x1ad   :  { %v981_v13 = vmul.f32 0.5, %v980_v0 }
 0x1ae   :  { %v1008_v36 = vmul.f32 %v1047_v25, %v1001_v12 }
 0x1af   :  { %v982_v39 = vsub.f32 1.5, %v981_v13 }
 0x1b0   :  { %v1056_v49 = vpop.eup %1055  ;;  %v1015_v55 = vadd.f32 %v1048_v35, %v1008_v36 }
 0x1b1   :  { %v983_v61 = vmul.f32 %v1054_v46, %v982_v39  ;;  %v989_v32 = vmul.f32 %v1056_v49, %v957_v48  ;;  %vm995_vm9 = vweird.f32 %v1056_v49 }
 0x1b2   :  { %1019 = vst [vmem:[#allocation7 + $0x8] sm:$0xff] %v1015_v55  ;;  %vm996_vm11 = vmor %vm994_vm10, %vm995_vm9 }
 0x1b3   :  { %v987_v7 = vsel %vm986_vm8, %v1054_v46, %v983_v61  ;;  %v990_v62 = vmul.f32 %v1056_v49, %v989_v32 }
 0x1b4   :  { %v1002_v8 = vmul.f32 %v987_v7, %v1622_v2 }
 0x1b5   :  { %v991_v20 = vmul.f32 0.5, %v990_v62 }
 0x1b6   :  { %v1009_v56 = vmul.f32 %v1047_v25, %v1002_v8 }
 0x1b7   :  { %v992_v18 = vsub.f32 1.5, %v991_v20 }
 0x1b8   :  { %v1016_v53 = vadd.f32 %v1048_v35, %v1009_v56 }
 0x1b9   :  { %v993_v29 = vmul.f32 %v1056_v49, %v992_v18 }
 0x1ba   :  { %1020 = vst [vmem:[#allocation7 + $0x10] sm:$0xff] %v1016_v53 }
 0x1bb   :  { %v997_v37 = vsel %vm996_vm11, %v1056_v49, %v993_v29 }
 0x1bc   :  { %v1003_v45 = vmul.f32 %v997_v37, %v1627_v17 }
 0x1be   :  { %v1010_v38 = vmul.f32 %v1047_v25, %v1003_v45 }
 0x1c0   :  { %v1017_v2 = vadd.f32 %v1048_v35, %v1010_v38 }
 0x1c2   :  { %1021 = vst [vmem:[#allocation7 + $0x18] sm:$0xff] %v1017_v2 }
 0x1c3   :  { %1034 = dma.vmem_to_hbm [thread:$0]  %s1027_s3, 512, %s1029_s5, [#allocation4], %s1136_s23, %s1136_s23, %s1137_s24  }
 0x1c4   :  { %1133 = dma.done.wait [#allocation4], 512  }
 0x1c5   :  { %1134 = vsyncadd [#allocation4], 4294966784 }
 0x1c6   :  { %1039 = vsyncpa [#allocation3], 1 }
 0x1c7   :  { %1040 = vsyncpa [#allocation6], 1 }
 0x1c8   :  { %1041 = vsyncpa [#allocation4], 1 }

</bundles_post_ra>
